<compile_context>
chip_gen: v7x
topology: tpu7x:2x2x1
jax: 0.10.0
libtpu: 0.0.40
codegen_flags: <defaults>
</compile_context>

<pallas_src>
import functools

import jax
import jax.numpy as jnp
from jax.experimental import pallas as pl
from jax.experimental.pallas import tpu as pltpu

LANE = 128  # TPU vreg lane width


def _round_up(n, m):
    return ((n + m - 1) // m) * m


def _mlp_kernel(n_layers, *refs):
    """Fused pointwise-MLP kernel.

    refs = (x_ref, w0, b0, w1, b1, ..., w_{L-1}, b_{L-1}, o_ref)
    All hidden (w, b) pairs are followed by ReLU; the last pair is the output
    projection (no activation).  Feature dims are NOT padded; Mosaic handles
    sub-128 lane tiles internally.
    """
    x_ref = refs[0]
    o_ref = refs[-1]
    params = refs[1:-1]

    h = x_ref[...]  # f32 (tile_batch, din)
    for li in range(n_layers):
        w_ref = params[2 * li]
        b_ref = params[2 * li + 1]
        # bf16 MXU inputs, f32 accumulation.
        acc = jnp.dot(h.astype(jnp.bfloat16), w_ref[...],
                      preferred_element_type=jnp.float32)
        acc = acc + b_ref[...]  # f32 bias add (VPU; v5e-friendly)
        if li < n_layers - 1:
            # TODO(synk): nn.Dropout(p=0.1) in train mode would mask/scale
            # here; implemented as identity (eval/inference semantics).
            h = jnp.maximum(acc, 0.0)  # ReLU in f32
        else:
            o_ref[...] = acc.astype(o_ref.dtype)


def _pick_tile_batch(B):
    """~8 grid steps (>=2 per v7x TC), tiles up to 1024 rows for large B."""
    target = pl.cdiv(B, 8)
    tile = _round_up(max(target, 8), 8)
    return min(tile, 1024)


def mlp_forward(x, weights, biases, *, tile_batch=None):
    """Run the fused MLP Pallas kernel.

    Args:
      x:       (B, input_size) float array.
      weights: list of (in_features, out_features) arrays; last one is fc_out.
      biases:  list of (out_features,) arrays, same order as weights.
    Returns:
      (B, output_size) float32.
    """
    B, din = x.shape
    out_size = weights[-1].shape[1]
    n_layers = len(weights)

    if tile_batch is None:
        tile_batch = _pick_tile_batch(B)
    tile_batch = max(8, _round_up(tile_batch, 8))
    Bp = _round_up(B, tile_batch)
    grid = (Bp // tile_batch,)

    # Only pad along the batch dim (and only if needed); features stay unpadded.
    x_in = x.astype(jnp.float32)
    if Bp != B:
        x_in = jnp.pad(x_in, ((0, Bp - B), (0, 0)))

    # Cast weights to bf16 (tiny, one-time); biases stay f32 as (1, out).
    params = []
    for w, b in zip(weights, biases):
        params.append(w.astype(jnp.bfloat16))
        params.append(b.astype(jnp.float32).reshape(1, -1))

    in_specs = [pl.BlockSpec((tile_batch, din), lambda i: (i, 0))]
    for p in params:
        # Full-array blocks, constant index_map -> resident in VMEM across all
        # grid steps; Buffered(1) skips the pointless second buffer.
        in_specs.append(
            pl.BlockSpec(p.shape, lambda i: (0, 0),
                         pipeline_mode=pl.Buffered(1)))

    out_spec = pl.BlockSpec((tile_batch, out_size), lambda i: (i, 0))

    # Real (unpadded) traffic for the scheduler hint.
    dims = [din] + [w.shape[1] for w in weights]
    flops = 2 * Bp * sum(dims[l] * dims[l + 1] for l in range(n_layers))
    bytes_accessed = (
        x_in.size * 4
        + sum(int(p.size) * p.dtype.itemsize for p in params)
        + Bp * out_size * 4
    )

    # VMEM estimate (lane/sublane-padded layouts): x + out double-buffered,
    # weights/biases single-buffered.  Clamped to the 32 MiB default today;
    # grows automatically if hidden dims are scaled up (v7x has 64 MiB).
    def _lp(d, m=LANE):
        return _round_up(d, m)
    vmem_est = 2 * tile_batch * _lp(din) * 4
    vmem_est += 2 * tile_batch * _lp(out_size) * 4
    vmem_est += sum(_round_up(w.shape[0], 16) * _lp(w.shape[1]) * 2
                    for w in weights)
    vmem_est += sum(8 * _lp(b.shape[0]) * 4 for b in biases)
    vmem_limit = int(min(64 * 1024 * 1024,
                         max(32 * 1024 * 1024, 2 * vmem_est)))

    kernel = functools.partial(_mlp_kernel, n_layers)

    out = pl.pallas_call(
        kernel,
        out_shape=jax.ShapeDtypeStruct((Bp, out_size), jnp.float32),
        grid_spec=pltpu.PrefetchScalarGridSpec(
            num_scalar_prefetch=0,
            grid=grid,
            in_specs=in_specs,
            out_specs=out_spec,
        ),
        compiler_params=pltpu.CompilerParams(
            dimension_semantics=("parallel",),
            vmem_limit_bytes=vmem_limit,
        ),
        cost_estimate=pl.CostEstimate(
            flops=flops, transcendentals=0, bytes_accessed=bytes_accessed
        ),
    )(x_in, *params)

    if Bp != B:
        out = out[:B]
    return out


def init_params(key, input_size, hidden_dim, output_size):
    """Deterministic synthetic init (PyTorch-like uniform fan-in scaling)."""
    sizes = [input_size] + list(hidden_dim) + [output_size]
    weights, biases = [], []
    for li in range(len(sizes) - 1):
        fan_in, fan_out = sizes[li], sizes[li + 1]
        key, kw, kb = jax.random.split(key, 3)
        bound = 1.0 / jnp.sqrt(fan_in)
        w = jax.random.uniform(kw, (fan_in, fan_out), jnp.float32, -bound, bound)
        b = jax.random.uniform(kb, (fan_out,), jnp.float32, -bound, bound)
        weights.append(w)
        biases.append(b)
    return weights, biases


def reference_forward(x, weights, biases):
    """Plain-JAX reference with the same bf16-MXU / f32-accumulate recipe."""
    h = x.astype(jnp.float32)
    n_hidden = len(weights) - 1
    for li in range(n_hidden):
        acc = jnp.dot(h.astype(jnp.bfloat16), weights[li].astype(jnp.bfloat16),
                      preferred_element_type=jnp.float32) + biases[li]
        h = jnp.maximum(acc, 0.0)
    return jnp.dot(h.astype(jnp.bfloat16), weights[-1].astype(jnp.bfloat16),
                   preferred_element_type=jnp.float32) + biases[-1]


if __name__ == "__main__":
    # Shapes consistent with the module's forward:
    #   input_size=16, hidden_dim=[32, 32], output_size=8
    # batch=256 -> default tile_batch=32 -> grid=(8,): pipelined, and an even
    # step count for v7x megacore sharding.
    input_size = 16
    hidden_dim = [32, 32]
    output_size = 8
    batch = 256

    key = jax.random.PRNGKey(0)
    key, kx = jax.random.split(key)
    x = jax.random.normal(kx, (batch, input_size), dtype=jnp.float32)

    weights, biases = init_params(key, input_size, hidden_dim, output_size)

    out = mlp_forward(x, weights, biases)
    out = jax.block_until_ready(out)

    ref = reference_forward(x, weights, biases)
    assert out.shape == (batch, output_size)
    assert jnp.allclose(out, ref, atol=1e-2, rtol=1e-2), "mismatch vs reference"

    print("KERNEL_OK")
</pallas_src>

<mosaic_0001>
module attributes {stable_mosaic.version = 11 : i64} {
  func.func @_mlp_kernel(%arg0: i32, %arg1: memref<32x16xf32, #tpu.memory_space<vmem>>, %arg2: memref<16x32xbf16, #tpu.memory_space<vmem>>, %arg3: memref<1x32xf32, #tpu.memory_space<vmem>>, %arg4: memref<32x32xbf16, #tpu.memory_space<vmem>>, %arg5: memref<1x32xf32, #tpu.memory_space<vmem>>, %arg6: memref<32x8xbf16, #tpu.memory_space<vmem>>, %arg7: memref<1x8xf32, #tpu.memory_space<vmem>>, %arg8: memref<32x8xf32, #tpu.memory_space<vmem>>) attributes {dimension_semantics = [#tpu.dimension_semantics<parallel>], iteration_bounds = array<i64: 8>, scalar_prefetch = 0 : i64, scratch_operands = 0 : i64, tpu.core_type = #tpu.core_type<tc>, window_params = [{transform_indices = @transform_0, window_bounds = array<i64: 32, 16>}, {pipeline_mode = #tpu.pipeline_mode<synchronous>, transform_indices = @transform_1, window_bounds = array<i64: 16, 32>}, {pipeline_mode = #tpu.pipeline_mode<synchronous>, transform_indices = @transform_2, window_bounds = array<i64: 1, 32>}, {pipeline_mode = #tpu.pipeline_mode<synchronous>, transform_indices = @transform_3, window_bounds = array<i64: 32, 32>}, {pipeline_mode = #tpu.pipeline_mode<synchronous>, transform_indices = @transform_4, window_bounds = array<i64: 1, 32>}, {pipeline_mode = #tpu.pipeline_mode<synchronous>, transform_indices = @transform_5, window_bounds = array<i64: 32, 8>}, {pipeline_mode = #tpu.pipeline_mode<synchronous>, transform_indices = @transform_6, window_bounds = array<i64: 1, 8>}, {transform_indices = @transform_7, window_bounds = array<i64: 32, 8>}]} {
    %c0 = arith.constant 0 : index
    %c0_0 = arith.constant 0 : index
    %0 = vector.load %arg1[%c0, %c0_0] : memref<32x16xf32, #tpu.memory_space<vmem>>, vector<32x16xf32>
    %1 = arith.truncf %0 : vector<32x16xf32> to vector<32x16xbf16>
    %c0_1 = arith.constant 0 : index
    %c0_2 = arith.constant 0 : index
    %2 = vector.load %arg2[%c0_1, %c0_2] : memref<16x32xbf16, #tpu.memory_space<vmem>>, vector<16x32xbf16>
    %cst = arith.constant dense<0.000000e+00> : vector<32x32xf32>
    %3 = tpu.matmul %1, %2, %cst {dimension_numbers = #tpu.dot_dimension_numbers<[1], [0], [0], [1], [0, 0, 1, 1], [], []>} : vector<32x16xbf16>, vector<16x32xbf16>, vector<32x32xf32> -> vector<32x32xf32>
    %c0_3 = arith.constant 0 : index
    %c0_4 = arith.constant 0 : index
    %4 = vector.load %arg3[%c0_3, %c0_4] : memref<1x32xf32, #tpu.memory_space<vmem>>, vector<1x32xf32>
    %5 = vector.broadcast %4 : vector<1x32xf32> to vector<32x32xf32>
    %6 = arith.addf %3, %5 : vector<32x32xf32>
    %cst_5 = arith.constant 0.000000e+00 : f32
    %7 = vector.broadcast %cst_5 : f32 to vector<32x32xf32>
    %8 = arith.maximumf %6, %7 : vector<32x32xf32>
    %9 = arith.truncf %8 : vector<32x32xf32> to vector<32x32xbf16>
    %c0_6 = arith.constant 0 : index
    %c0_7 = arith.constant 0 : index
    %10 = vector.load %arg4[%c0_6, %c0_7] : memref<32x32xbf16, #tpu.memory_space<vmem>>, vector<32x32xbf16>
    %cst_8 = arith.constant dense<0.000000e+00> : vector<32x32xf32>
    %11 = tpu.matmul %9, %10, %cst_8 {dimension_numbers = #tpu.dot_dimension_numbers<[1], [0], [0], [1], [0, 0, 1, 1], [], []>} : vector<32x32xbf16>, vector<32x32xbf16>, vector<32x32xf32> -> vector<32x32xf32>
    %c0_9 = arith.constant 0 : index
    %c0_10 = arith.constant 0 : index
    %12 = vector.load %arg5[%c0_9, %c0_10] : memref<1x32xf32, #tpu.memory_space<vmem>>, vector<1x32xf32>
    %13 = vector.broadcast %12 : vector<1x32xf32> to vector<32x32xf32>
    %14 = arith.addf %11, %13 : vector<32x32xf32>
    %cst_11 = arith.constant 0.000000e+00 : f32
    %15 = vector.broadcast %cst_11 : f32 to vector<32x32xf32>
    %16 = arith.maximumf %14, %15 : vector<32x32xf32>
    %17 = arith.truncf %16 : vector<32x32xf32> to vector<32x32xbf16>
    %c0_12 = arith.constant 0 : index
    %c0_13 = arith.constant 0 : index
    %18 = vector.load %arg6[%c0_12, %c0_13] : memref<32x8xbf16, #tpu.memory_space<vmem>>, vector<32x8xbf16>
    %cst_14 = arith.constant dense<0.000000e+00> : vector<32x8xf32>
    %19 = tpu.matmul %17, %18, %cst_14 {dimension_numbers = #tpu.dot_dimension_numbers<[1], [0], [0], [1], [0, 0, 1, 1], [], []>} : vector<32x32xbf16>, vector<32x8xbf16>, vector<32x8xf32> -> vector<32x8xf32>
    %c0_15 = arith.constant 0 : index
    %c0_16 = arith.constant 0 : index
    %20 = vector.load %arg7[%c0_15, %c0_16] : memref<1x8xf32, #tpu.memory_space<vmem>>, vector<1x8xf32>
    %21 = vector.broadcast %20 : vector<1x8xf32> to vector<32x8xf32>
    %22 = arith.addf %19, %21 : vector<32x8xf32>
    %c0_17 = arith.constant 0 : index
    %c0_18 = arith.constant 0 : index
    %23 = vector.load %arg8[%c0_17, %c0_18] : memref<32x8xf32, #tpu.memory_space<vmem>>, vector<32x8xf32>
    tpu.vector_store %arg8[%c0_17, %c0_18], %22 {strides = array<i32>} : memref<32x8xf32, #tpu.memory_space<vmem>>, vector<32x8xf32>,
    return
  }
  func.func @transform_0(%arg0: i32) -> (i32, i32) {
    %c0_i32 = arith.constant 0 : i32
    %c0_i32_0 = arith.constant 0 : i32
    return %arg0, %c0_i32 : i32, i32
  }
  func.func @transform_1(%arg0: i32) -> (i32, i32) {
    %c0_i32 = arith.constant 0 : i32
    %c0_i32_0 = arith.constant 0 : i32
    %c0_i32_1 = arith.constant 0 : i32
    return %c0_i32, %c0_i32_0 : i32, i32
  }
  func.func @transform_2(%arg0: i32) -> (i32, i32) {
    %c0_i32 = arith.constant 0 : i32
    %c0_i32_0 = arith.constant 0 : i32
    %c0_i32_1 = arith.constant 0 : i32
    return %c0_i32, %c0_i32_0 : i32, i32
  }
  func.func @transform_3(%arg0: i32) -> (i32, i32) {
    %c0_i32 = arith.constant 0 : i32
    %c0_i32_0 = arith.constant 0 : i32
    %c0_i32_1 = arith.constant 0 : i32
    return %c0_i32, %c0_i32_0 : i32, i32
  }
  func.func @transform_4(%arg0: i32) -> (i32, i32) {
    %c0_i32 = arith.constant 0 : i32
    %c0_i32_0 = arith.constant 0 : i32
    %c0_i32_1 = arith.constant 0 : i32
    return %c0_i32, %c0_i32_0 : i32, i32
  }
  func.func @transform_5(%arg0: i32) -> (i32, i32) {
    %c0_i32 = arith.constant 0 : i32
    %c0_i32_0 = arith.constant 0 : i32
    %c0_i32_1 = arith.constant 0 : i32
    return %c0_i32, %c0_i32_0 : i32, i32
  }
  func.func @transform_6(%arg0: i32) -> (i32, i32) {
    %c0_i32 = arith.constant 0 : i32
    %c0_i32_0 = arith.constant 0 : i32
    %c0_i32_1 = arith.constant 0 : i32
    return %c0_i32, %c0_i32_0 : i32, i32
  }
  func.func @transform_7(%arg0: i32) -> (i32, i32) {
    %c0_i32 = arith.constant 0 : i32
    %c0_i32_0 = arith.constant 0 : i32
    return %arg0, %c0_i32 : i32, i32
  }
}

</mosaic_0001>

<bundles_post_ra>
// kernel: tpu_custom_call.1
= control target key start
LH: loop header
LB: loop body
LE: loop exit
PB: predicated region body
PF: predicated region fallthrough
CT: control target
= control target key end

     0   :  { %s709_s24 = smov 0   ;;  %s761_s0 = inlined_call_operand.vmem [shape: f32[256,16], index: 0, kind: input, shape index: {}]   ;;  %s762_s1 = inlined_call_operand.vmem [shape: bf16[16,32], index: 1, kind: input, shape index: {}]   ;;  %s763_s2 = inlined_call_operand.vmem [shape: f32[1,32], index: 2, kind: input, shape index: {}]   ;;  %s764_s3 = inlined_call_operand.vmem [shape: bf16[32,32], index: 3, kind: input, shape index: {}]   ;;  %s765_s4 = inlined_call_operand.vmem [shape: f32[1,32], index: 4, kind: input, shape index: {}]   ;;  %s766_s5 = inlined_call_operand.vmem [shape: bf16[32,8], index: 5, kind: input, shape index: {}]   ;;  %s767_s6 = inlined_call_operand.vmem [shape: f32[1,8], index: 6, kind: input, shape index: {}]   ;;  %s768_s7 = inlined_call_operand.vmem [shape: f32[256,8], index: 7, kind: output, shape index: {}]  }
   0x1 LB: > { %s590_s25 = sadd.s32 4294967295, %s667_s24   ;;  %p594_p0 = scmp.ge.s32.totalorder %s667_s24, 1  ;;  %s667_s24 = sphi %s709_s24, %s17_s24  }
   0x2   : > { %p238_p1 = scmp.lt.s32.totalorder %s667_s24, 9 }
   0x4   : > { %p239_p2 = pnand %p594_p0, %p238_p1 }
   0x5   : > { %v656_v0 = vld [vmem:[%s762_s1] sm:$0xff] (!%p239_p2)   ;;  %s595_s28 = sshll.u32 (!%p239_p2), %s590_s25, 2  ;;  %vm304_vm0 = vcmask (!%p239_p2), 130048   ;;  %v658_v8 = vld [vmem:[%s764_s3 + $0x8] sm:$0xff] (!%p239_p2)   ;;  %vm389_vm1 = vcmask (!%p239_p2), 261120   ;;  %vm529_vm2 = vcmask (!%p239_p2), 64512  }
   0x6   : > { %242 = sbr.rel (%p239_p2) target bundleno = 682 (0x2aa), region = 48  ;;  %p271_p3 = scmp.lt.s32.totalorder (!%p239_p2), %s595_s28, 31  ;;  %626 = vmatprep.subr.bf16.mxu0 (!%p239_p2), %v656_v0  ;;  %v657_v7 = vld [vmem:[%s764_s3] sm:$0xff] (!%p239_p2)   ;;  %v660_v25 = vld [vmem:[%s766_s5 + $0x8] sm:$0xff] (!%p239_p2)  }
   0x7   : > { %627 = vmatpush3.bf16.msra.mxu0 (!%p239_p2), %v656_v0  ;;  %632 = vmatprep.subr.bf16.mxu1 (!%p239_p2), %v657_v7  ;;  %v599_v9 = vld [vmem:[%s763_s2] ss:$0 sm:$0xff] (!%p239_p2) }
   0x8   : > { %633 = vmatpush3.bf16.msra.mxu1 (!%p239_p2), %v657_v7  ;;  %v659_v24 = vld [vmem:[%s766_s5] sm:$0xff] (!%p239_p2)  }
   0x9   : > { %634 = vmatprep.subr.bf16.mxu1 (!%p239_p2), %v658_v8  ;;  %640 = vmatprep.subr.bf16.mxu0 (!%p239_p2), %v659_v24  ;;  %v603_v26 = vld [vmem:[%s765_s4] ss:$0 sm:$0xff] (!%p239_p2) }
   0xa   : > { %v608_v41 = vld [vmem:[%s767_s6] ss:$0 sm:$0xff] (!%p239_p2) }
   0xc   : > { %635 = vmatpush3.bf16.msra.mxu1 (!%p239_p2), %v658_v8 }
   0xd   : > { %s770_s28 = smov (!%p271_p3, %s595_s28), 31 }
   0xe   : > { %s596_s29 = sshll.u32 %s770_s28, 3 }
   0xf   : > { %s274_s9 = scalar_lea.vmem %s761_s0, %s596_s29  ;;  %s280_s27 = scalar_lea.vmem %s768_s7, %s596_s29 }
  0x10   : > { %v283_v1 = vld [vmem:[%s274_s9] sm:$0xff]  ;;  %v284_v2 = vld [vmem:[%s274_s9 + $0x8] sm:$0xff]  ;;  %v285_v3 = vld [vmem:[%s274_s9 + $0x10] sm:$0xff] }
  0x11   : > { %v287_v4 = vpack.c.bf16 %v284_v2, %v283_v1  ;;  %v286_v5 = vld [vmem:[%s274_s9 + $0x18] sm:$0xff] }
  0x12   : > { %v288_v6 = vpack.c.bf16 %v286_v5, %v285_v3 }
  0x13   : > { %628 = vmatprep.mubr.msk.bf16.mxu0 %vm304_vm0, %v287_v4 }
  0x14   : > { %629 = vmatmul.mubr.msk.bf16.vlgmr.msra.gmra.mrb[0].mxu0 %vm304_vm0, %v288_v6 }
  0x15   : > { %641 = vmatpush3.bf16.msra.mxu0 %v659_v24 }
  0x16   : > { %642 = vmatprep.subr.bf16.mxu0 %v660_v25 }
  0x19   : > { %643 = vmatpush3.bf16.msra.mxu0 %v660_v25 }
  0xe7   : > { %v630_v10 = vpop.f32.mrb[0].mxu0 }
  0xe8   : > { %v354_v11 = vadd.f32 %v630_v10, %v599_v9  ;;  %v345_v12 = vpop.f32.mrb[1].mxu0 }
  0xe9   : > { %v346_v13 = vadd.f32 %v599_v9, %v345_v12  ;;  %v631_v14 = vpop.f32.mrb[2].mxu0 }
  0xea   : > { %v357_v15 = vadd.f32 %v631_v14, %v599_v9  ;;  %v348_v16 = vpop.f32.mrb[3].mxu0  ;;  %v362_v18 = vmax.f32 %v354_v11, 0.0 }
  0xeb   : > { %v349_v17 = vadd.f32 %v599_v9, %v348_v16  ;;  %v360_v20 = vmax.f32 %v346_v13, 0.0 }
  0xec   : > { %v363_v19 = vmax.f32 %v357_v15, 0.0 }
  0xed   : > { %v361_v21 = vmax.f32 %v349_v17, 0.0 }
  0xee   : > { %v365_v22 = vpack.c.bf16 %v363_v19, %v362_v18 }
  0xef   : > { %v364_v23 = vpack.c.bf16 %v361_v21, %v360_v20 }
  0xf1   : > { %636 = vmatprep.mubr.msk.bf16.mxu1 %vm389_vm1, %v364_v23 }
  0xf2   : > { %637 = vmatmul.mubr.msk.bf16.vlgmr.msra.gmra.mrb[0].mxu1 %vm389_vm1, %v365_v22 }
 0x1c5   : > { %v638_v27 = vpop.f32.mrb[0].mxu1 }
 0x1c6   : > { %v439_v28 = vadd.f32 %v638_v27, %v603_v26  ;;  %v430_v29 = vpop.f32.mrb[1].mxu1 }
 0x1c7   : > { %v431_v30 = vadd.f32 %v603_v26, %v430_v29  ;;  %v639_v31 = vpop.f32.mrb[2].mxu1 }
 0x1c8   : > { %v442_v32 = vadd.f32 %v639_v31, %v603_v26  ;;  %v433_v33 = vpop.f32.mrb[3].mxu1  ;;  %v447_v35 = vmax.f32 %v439_v28, 0.0 }
 0x1c9   : > { %v434_v34 = vadd.f32 %v603_v26, %v433_v33  ;;  %v445_v37 = vmax.f32 %v431_v30, 0.0 }
 0x1ca   : > { %v448_v36 = vmax.f32 %v442_v32, 0.0 }
 0x1cb   : > { %v446_v38 = vmax.f32 %v434_v34, 0.0 }
 0x1cc   : > { %v450_v39 = vpack.c.bf16 %v448_v36, %v447_v35 }
 0x1cd   : > { %v449_v40 = vpack.c.bf16 %v446_v38, %v445_v37 }
 0x1cf   : > { %644 = vmatprep.mubr.msk.bf16.mxu0 %vm389_vm1, %v449_v40 }
 0x1d0   : > { %645 = vmatmul.mubr.msk.bf16.vlgmr.msra.gmra.mrb[4].mxu0 %vm389_vm1, %v450_v39 }
 0x2a3   : > { %v646_v42 = vpop.f32.mrb[4].mxu0 }
 0x2a4   : > { %v523_v43 = vadd.f32 %v646_v42, %v608_v41  ;;  %v514_v44 = vpop.f32.mrb[5].mxu0 }
 0x2a5   : > { %v515_v45 = vadd.f32 %v608_v41, %v514_v44  ;;  %v647_v46 = vpop.f32.mrb[6].mxu0 }
 0x2a6   : > { %532 = vst.msk [vmem:[%s280_s27 + $0x10] sm:$0xff] %vm529_vm2, %v523_v43  ;;  %v526_v47 = vadd.f32 %v647_v46, %v608_v41  ;;  %v517_v48 = vpop.f32.mrb[7].mxu0 }
 0x2a7   : > { %530 = vst.msk [vmem:[%s280_s27] sm:$0xff] %vm529_vm2, %v515_v45  ;;  %v518_v49 = vadd.f32 %v608_v41, %v517_v48 }
 0x2a8   : > { %533 = vst.msk [vmem:[%s280_s27 + $0x18] sm:$0xff] %vm529_vm2, %v526_v47 }
 0x2a9   : > { %531 = vst.msk [vmem:[%s280_s27 + $0x8] sm:$0xff] %vm529_vm2, %v518_v49 }
 0x2aa PF: > { %s17_s24 = sadd.s32 1, %s667_s24  }
 0x2ab   : > { %p14_p4 = scmp.ge.s32.totalorder %s17_s24, 10  }
 0x2ad   :  { %16 = sbr.rel (!%p14_p4) target bundleno = 1 (0x1), region = 78 }

</bundles_post_ra>
